<compile_context>
chip_gen: v6e
topology: v6e:2x2x1
jax: 0.10.0
libtpu: 0.0.40
codegen_flags: <defaults>
</compile_context>

<pallas_src>
import functools
import math

import jax
import jax.numpy as jnp
import numpy as np
from jax import lax
from jax.experimental import pallas as pl
from jax.experimental.pallas import tpu as pltpu


def _attention_compute(xq, xk, xv,
                       wq_ref, bq_ref, wk_t_ref, bk_t_ref, wv_ref, bv_ref,
                       wo_ref, bo_ref, out_ref, *, d_k, d_v, h):
    """Shared body. xq: (tq, d_model) bf16; xk/xv: (nk, d_model) bf16."""
    f32 = jnp.float32
    bf16 = jnp.bfloat16
    scale = 1.0 / math.sqrt(d_k)

    # ---- lane-dense, full-width projections (bf16 in, f32 accumulation) ----
    # Q: (tq, h*d_k); fold 1/sqrt(d_k) here (tq*h*d_k elems, not tq*nk).
    q_all = jnp.dot(xq, wq_ref[...], preferred_element_type=f32) + bq_ref[...]
    q_all = (q_all * scale).astype(bf16)

    # K projected directly into transposed (h*d_k, nk) layout via a trans_b
    # contraction: per-head K selection is an aligned sublane slice and the
    # per-head QK^T is a plain (tq, d_k) @ (d_k, nk) matmul (no K transpose).
    k_allT = lax.dot_general(wk_t_ref[...], xk, (((1,), (1,)), ((), ())),
                             preferred_element_type=f32) + bk_t_ref[...]
    k_allT = k_allT.astype(bf16)

    # V: (nk, h*d_v).
    v_all = (jnp.dot(xv, wv_ref[...], preferred_element_type=f32)
             + bv_ref[...]).astype(bf16)

    # ---- per-head attention (statically unrolled; h is small) ----
    head_outs = []
    for hh in range(h):
        q_h = q_all[:, hh * d_k:(hh + 1) * d_k]        # (tq, d_k)  lane slice
        k_hT = k_allT[hh * d_k:(hh + 1) * d_k, :]      # (d_k, nk)  sublane slice
        v_h = v_all[:, hh * d_v:(hh + 1) * d_v]        # (nk, d_v)  lane slice

        att = jnp.dot(q_h, k_hT, preferred_element_type=f32)      # (tq, nk) f32
        att = att - jnp.max(att, axis=-1, keepdims=True)
        p = jnp.exp(att)                                          # f32 (v5e-friendly)
        l = jnp.sum(p, axis=-1, keepdims=True)
        # att@V first; normalize the (tq, d_v) result afterwards so the MXU
        # matmul issues without waiting on the XLU row-sum / EUP reciprocal.
        o_h = jnp.dot(p.astype(bf16), v_h, preferred_element_type=f32)   # (tq, d_v)
        o_h = o_h * pl.reciprocal(l, approx=True)
        head_outs.append(o_h.astype(bf16))

    # ---- single fused fc_o over the concatenated heads ----
    o_cat = jnp.concatenate(head_outs, axis=-1)                    # (tq, h*d_v) bf16
    out = jnp.dot(o_cat, wo_ref[...], preferred_element_type=f32) + bo_ref[...]
    out_ref[0] = out.astype(out_ref.dtype)


def _attn_kernel(q_ref, k_ref, v_ref, *rest, d_k, d_v, h):
    _attention_compute(q_ref[0], k_ref[0], v_ref[0], *rest, d_k=d_k, d_v=d_v, h=h)


def _attn_kernel_shared_kv(q_ref, kv_ref, *rest, d_k, d_v, h):
    xkv = kv_ref[0]
    _attention_compute(q_ref[0], xkv, xkv, *rest, d_k=d_k, d_v=d_v, h=h)


def _q_tile(nq):
    """q-tile size: full nq for short sequences, else a multiple-of-8 divisor."""
    if nq <= 256:
        return nq
    for t in (256, 128, 64, 32, 16, 8):
        if nq % t == 0:
            return t
    return nq


def _vmem_limit_bytes(tq, nk, d_model, d_k, d_v, h):
    """Rough VMEM estimate (x2 safety), clamped to [32 MiB, 64 MiB] so it is
    valid on every generation (v7x physical VMEM is 64 MiB)."""
    bf16, f32 = 2, 4
    act = (tq + 2 * nk) * d_model * bf16 * 2            # double-buffered activation blocks
    wts = 2 * d_model * h * (d_k + d_v) * bf16 * 2      # wq + wk_t + wv + wo
    proj = (tq * h * d_k + nk * h * (d_k + d_v)) * f32  # q_all / k_allT / v_all
    att = tq * nk * f32 * 2
    outb = tq * d_model * f32 * 2
    est = act + wts + proj + att + outb
    return int(min(max(32 << 20, 2 * est), 64 << 20))


def attention_forward(queries, keys, values, params, *, d_k, d_v, h):
    b_s, nq, d_model = queries.shape
    nk = keys.shape[1]
    bf16 = jnp.bfloat16
    f32 = jnp.float32

    # bf16 at the call boundary (weights AND activations); matmuls accumulate in f32.
    q_b = queries.astype(bf16)
    k_b = keys.astype(bf16)

    wq = params["wq"].astype(bf16)                        # (d_model, h*d_k)
    bq = params["bq"].astype(f32)                         # (1, h*d_k)
    wk_t = params["wk"].T.astype(bf16)                    # (h*d_k, d_model)
    bk_t = params["bk"].reshape(h * d_k, 1).astype(f32)   # (h*d_k, 1)
    wv = params["wv"].astype(bf16)                        # (d_model, h*d_v)
    bv = params["bv"].astype(f32)                         # (1, h*d_v)
    wo = params["wo"].astype(bf16)                        # (h*d_v, d_model)
    bo = params["bo"].astype(f32)                         # (1, d_model)

    tq = _q_tile(nq)
    n_qt = nq // tq

    weight_specs = [
        pl.BlockSpec((d_model, h * d_k), lambda b, q: (0, 0)),   # wq
        pl.BlockSpec((1, h * d_k),       lambda b, q: (0, 0)),   # bq
        pl.BlockSpec((h * d_k, d_model), lambda b, q: (0, 0)),   # wk_t
        pl.BlockSpec((h * d_k, 1),       lambda b, q: (0, 0)),   # bk_t
        pl.BlockSpec((d_model, h * d_v), lambda b, q: (0, 0)),   # wv
        pl.BlockSpec((1, h * d_v),       lambda b, q: (0, 0)),   # bv
        pl.BlockSpec((h * d_v, d_model), lambda b, q: (0, 0)),   # wo
        pl.BlockSpec((1, d_model),       lambda b, q: (0, 0)),   # bo
    ]
    weight_args = (wq, bq, wk_t, bk_t, wv, bv, wo, bo)

    q_spec = pl.BlockSpec((1, tq, d_model), lambda b, q: (b, q, 0))
    kv_spec = pl.BlockSpec((1, nk, d_model), lambda b, q: (b, 0, 0))

    if keys is values:
        # Self-/cross-attention fast path: DMA the K/V activation block once.
        kernel = functools.partial(_attn_kernel_shared_kv, d_k=d_k, d_v=d_v, h=h)
        in_specs = [q_spec, kv_spec] + weight_specs
        args = (q_b, k_b) + weight_args
    else:
        v_b = values.astype(bf16)
        kernel = functools.partial(_attn_kernel, d_k=d_k, d_v=d_v, h=h)
        in_specs = [q_spec, kv_spec, kv_spec] + weight_specs
        args = (q_b, k_b, v_b) + weight_args

    out = pl.pallas_call(
        kernel,
        out_shape=jax.ShapeDtypeStruct((b_s, nq, d_model), jnp.float32),
        grid_spec=pltpu.PrefetchScalarGridSpec(
            num_scalar_prefetch=0,
            grid=(b_s, n_qt),
            in_specs=in_specs,
            out_specs=pl.BlockSpec((1, tq, d_model), lambda b, q: (b, q, 0)),
        ),
        compiler_params=pltpu.CompilerParams(
            dimension_semantics=("parallel", "parallel"),
            vmem_limit_bytes=_vmem_limit_bytes(tq, nk, d_model, d_k, d_v, h),
        ),
    )(*args)
    return out


def _reference(queries, keys, values, params, *, d_k, d_v, h):
    """Pure-JAX f32 reference replicating the PyTorch forward (eval mode)."""
    b_s, nq, d_model = queries.shape
    nk = keys.shape[1]
    q = (queries @ params["wq"] + params["bq"]).reshape(b_s, nq, h, d_k).transpose(0, 2, 1, 3)
    k = (keys @ params["wk"] + params["bk"]).reshape(b_s, nk, h, d_k).transpose(0, 2, 3, 1)
    v = (values @ params["wv"] + params["bv"]).reshape(b_s, nk, h, d_v).transpose(0, 2, 1, 3)
    att = jnp.matmul(q, k) / np.sqrt(d_k)
    att = jax.nn.softmax(att, axis=-1)
    out = jnp.matmul(att, v).transpose(0, 2, 1, 3).reshape(b_s, nq, h * d_v)
    return out @ params["wo"] + params["bo"]


if __name__ == "__main__":
    # Small shapes consistent with the module.
    b_s, nq, nk = 2, 8, 8
    d_model, d_k, d_v, h = 32, 16, 16, 4

    key = jax.random.PRNGKey(0)
    ks = jax.random.split(key, 12)

    def init_linear(kw, kb, fan_in, fan_out):
        bound = 1.0 / math.sqrt(fan_in)
        w = jax.random.uniform(kw, (fan_in, fan_out), jnp.float32, -bound, bound)
        b = jax.random.uniform(kb, (1, fan_out), jnp.float32, -bound, bound)
        return w, b

    wq, bq = init_linear(ks[0], ks[1], d_model, h * d_k)
    wk, bk = init_linear(ks[2], ks[3], d_model, h * d_k)
    wv, bv = init_linear(ks[4], ks[5], d_model, h * d_v)
    wo, bo = init_linear(ks[6], ks[7], h * d_v, d_model)
    params = dict(wq=wq, bq=bq, wk=wk, bk=bk, wv=wv, bv=bv, wo=wo, bo=bo)

    queries = jax.random.normal(ks[8], (b_s, nq, d_model), jnp.float32)
    keys = jax.random.normal(ks[9], (b_s, nk, d_model), jnp.float32)
    values = jax.random.normal(ks[10], (b_s, nk, d_model), jnp.float32)

    # Distinct q/k/v path.
    out = attention_forward(queries, keys, values, params, d_k=d_k, d_v=d_v, h=h)
    out = jax.block_until_ready(out)
    ref = _reference(queries, keys, values, params, d_k=d_k, d_v=d_v, h=h)
    # Tolerance accounts for bf16 matmul inputs (f32 accumulation) + approx reciprocal.
    np.testing.assert_allclose(np.asarray(out), np.asarray(ref), rtol=5e-2, atol=5e-2)

    # Shared key/value fast path.
    out2 = attention_forward(queries, keys, keys, params, d_k=d_k, d_v=d_v, h=h)
    out2 = jax.block_until_ready(out2)
    ref2 = _reference(queries, keys, keys, params, d_k=d_k, d_v=d_v, h=h)
    np.testing.assert_allclose(np.asarray(out2), np.asarray(ref2), rtol=5e-2, atol=5e-2)

    print("KERNEL_OK")
</pallas_src>

<mosaic_0001>
module attributes {stable_mosaic.version = 11 : i64} {
  func.func @_attn_kernel(%arg0: i32, %arg1: i32, %arg2: memref<1x8x32xbf16, #tpu.memory_space<vmem>>, %arg3: memref<1x8x32xbf16, #tpu.memory_space<vmem>>, %arg4: memref<1x8x32xbf16, #tpu.memory_space<vmem>>, %arg5: memref<32x64xbf16, #tpu.memory_space<vmem>>, %arg6: memref<1x64xf32, #tpu.memory_space<vmem>>, %arg7: memref<64x32xbf16, #tpu.memory_space<vmem>>, %arg8: memref<64x1xf32, #tpu.memory_space<vmem>>, %arg9: memref<32x64xbf16, #tpu.memory_space<vmem>>, %arg10: memref<1x64xf32, #tpu.memory_space<vmem>>, %arg11: memref<64x32xbf16, #tpu.memory_space<vmem>>, %arg12: memref<1x32xf32, #tpu.memory_space<vmem>>, %arg13: memref<1x8x32xf32, #tpu.memory_space<vmem>>) attributes {dimension_semantics = [#tpu.dimension_semantics<parallel>, #tpu.dimension_semantics<parallel>], iteration_bounds = array<i64: 2, 1>, scalar_prefetch = 0 : i64, scratch_operands = 0 : i64, tpu.core_type = #tpu.core_type<tc>, window_params = [{transform_indices = @transform_0, window_bounds = array<i64: 1, 8, 32>}, {transform_indices = @transform_1, window_bounds = array<i64: 1, 8, 32>}, {transform_indices = @transform_2, window_bounds = array<i64: 1, 8, 32>}, {pipeline_mode = #tpu.pipeline_mode<synchronous>, transform_indices = @transform_3, window_bounds = array<i64: 32, 64>}, {pipeline_mode = #tpu.pipeline_mode<synchronous>, transform_indices = @transform_4, window_bounds = array<i64: 1, 64>}, {pipeline_mode = #tpu.pipeline_mode<synchronous>, transform_indices = @transform_5, window_bounds = array<i64: 64, 32>}, {pipeline_mode = #tpu.pipeline_mode<synchronous>, transform_indices = @transform_6, window_bounds = array<i64: 64, 1>}, {pipeline_mode = #tpu.pipeline_mode<synchronous>, transform_indices = @transform_7, window_bounds = array<i64: 32, 64>}, {pipeline_mode = #tpu.pipeline_mode<synchronous>, transform_indices = @transform_8, window_bounds = array<i64: 1, 64>}, {pipeline_mode = #tpu.pipeline_mode<synchronous>, transform_indices = @transform_9, window_bounds = array<i64: 64, 32>}, {pipeline_mode = #tpu.pipeline_mode<synchronous>, transform_indices = @transform_10, window_bounds = array<i64: 1, 32>}, {transform_indices = @transform_11, window_bounds = array<i64: 1, 8, 32>}]} {
    %c0 = arith.constant 0 : index
    %c0_0 = arith.constant 0 : index
    %c0_1 = arith.constant 0 : index
    %0 = vector.load %arg2[%c0, %c0_0, %c0_1] : memref<1x8x32xbf16, #tpu.memory_space<vmem>>, vector<1x8x32xbf16>
    %1 = vector.shape_cast %0 : vector<1x8x32xbf16> to vector<8x32xbf16>
    %c0_2 = arith.constant 0 : index
    %c0_3 = arith.constant 0 : index
    %c0_4 = arith.constant 0 : index
    %2 = vector.load %arg3[%c0_2, %c0_3, %c0_4] : memref<1x8x32xbf16, #tpu.memory_space<vmem>>, vector<1x8x32xbf16>
    %3 = vector.shape_cast %2 : vector<1x8x32xbf16> to vector<8x32xbf16>
    %c0_5 = arith.constant 0 : index
    %c0_6 = arith.constant 0 : index
    %c0_7 = arith.constant 0 : index
    %4 = vector.load %arg4[%c0_5, %c0_6, %c0_7] : memref<1x8x32xbf16, #tpu.memory_space<vmem>>, vector<1x8x32xbf16>
    %5 = vector.shape_cast %4 : vector<1x8x32xbf16> to vector<8x32xbf16>
    %c0_8 = arith.constant 0 : index
    %c0_9 = arith.constant 0 : index
    %6 = vector.load %arg5[%c0_8, %c0_9] : memref<32x64xbf16, #tpu.memory_space<vmem>>, vector<32x64xbf16>
    %cst = arith.constant dense<0.000000e+00> : vector<8x64xf32>
    %7 = tpu.matmul %1, %6, %cst {dimension_numbers = #tpu.dot_dimension_numbers<[1], [0], [0], [1], [0, 0, 1, 1], [], []>} : vector<8x32xbf16>, vector<32x64xbf16>, vector<8x64xf32> -> vector<8x64xf32>
    %c0_10 = arith.constant 0 : index
    %c0_11 = arith.constant 0 : index
    %8 = vector.load %arg6[%c0_10, %c0_11] : memref<1x64xf32, #tpu.memory_space<vmem>>, vector<1x64xf32>
    %9 = vector.broadcast %8 : vector<1x64xf32> to vector<8x64xf32>
    %10 = arith.addf %7, %9 : vector<8x64xf32>
    %cst_12 = arith.constant 2.500000e-01 : f32
    %11 = vector.broadcast %cst_12 : f32 to vector<8x64xf32>
    %12 = arith.mulf %10, %11 : vector<8x64xf32>
    %13 = arith.truncf %12 : vector<8x64xf32> to vector<8x64xbf16>
    %c0_13 = arith.constant 0 : index
    %c0_14 = arith.constant 0 : index
    %14 = vector.load %arg7[%c0_13, %c0_14] : memref<64x32xbf16, #tpu.memory_space<vmem>>, vector<64x32xbf16>
    %cst_15 = arith.constant dense<0.000000e+00> : vector<64x8xf32>
    %15 = tpu.matmul %14, %3, %cst_15 {dimension_numbers = #tpu.dot_dimension_numbers<[1], [1], [0], [0], [0, 0, 1, 0], [], []>} : vector<64x32xbf16>, vector<8x32xbf16>, vector<64x8xf32> -> vector<64x8xf32>
    %c0_16 = arith.constant 0 : index
    %c0_17 = arith.constant 0 : index
    %16 = vector.load %arg8[%c0_16, %c0_17] : memref<64x1xf32, #tpu.memory_space<vmem>>, vector<64x1xf32>
    %17 = vector.broadcast %16 : vector<64x1xf32> to vector<64x8xf32>
    %18 = arith.addf %15, %17 : vector<64x8xf32>
    %19 = arith.truncf %18 : vector<64x8xf32> to vector<64x8xbf16>
    %c0_18 = arith.constant 0 : index
    %c0_19 = arith.constant 0 : index
    %20 = vector.load %arg9[%c0_18, %c0_19] : memref<32x64xbf16, #tpu.memory_space<vmem>>, vector<32x64xbf16>
    %cst_20 = arith.constant dense<0.000000e+00> : vector<8x64xf32>
    %21 = tpu.matmul %5, %20, %cst_20 {dimension_numbers = #tpu.dot_dimension_numbers<[1], [0], [0], [1], [0, 0, 1, 1], [], []>} : vector<8x32xbf16>, vector<32x64xbf16>, vector<8x64xf32> -> vector<8x64xf32>
    %c0_21 = arith.constant 0 : index
    %c0_22 = arith.constant 0 : index
    %22 = vector.load %arg10[%c0_21, %c0_22] : memref<1x64xf32, #tpu.memory_space<vmem>>, vector<1x64xf32>
    %23 = vector.broadcast %22 : vector<1x64xf32> to vector<8x64xf32>
    %24 = arith.addf %21, %23 : vector<8x64xf32>
    %25 = arith.truncf %24 : vector<8x64xf32> to vector<8x64xbf16>
    %26 = vector.extract_strided_slice %13 {offsets = [0, 0], sizes = [8, 16], strides = [1, 1]} : vector<8x64xbf16> to vector<8x16xbf16>
    %27 = vector.extract_strided_slice %19 {offsets = [0, 0], sizes = [16, 8], strides = [1, 1]} : vector<64x8xbf16> to vector<16x8xbf16>
    %28 = vector.extract_strided_slice %25 {offsets = [0, 0], sizes = [8, 16], strides = [1, 1]} : vector<8x64xbf16> to vector<8x16xbf16>
    %cst_23 = arith.constant dense<0.000000e+00> : vector<8x8xf32>
    %29 = tpu.matmul %26, %27, %cst_23 {dimension_numbers = #tpu.dot_dimension_numbers<[1], [0], [0], [1], [0, 0, 1, 1], [], []>} : vector<8x16xbf16>, vector<16x8xbf16>, vector<8x8xf32> -> vector<8x8xf32>
    %cst_24 = arith.constant dense<0xFF800000> : vector<8xf32>
    %30 = vector.multi_reduction <maximumf>, %29, %cst_24 [1] : vector<8x8xf32> to vector<8xf32>
    %31 = vector.shape_cast %30 : vector<8xf32> to vector<8x1xf32>
    %32 = vector.broadcast %31 : vector<8x1xf32> to vector<8x8xf32>
    %33 = arith.subf %29, %32 : vector<8x8xf32>
    %34 = math.exp %33 : vector<8x8xf32>
    %cst_25 = arith.constant dense<0.000000e+00> : vector<8xf32>
    %35 = vector.multi_reduction <add>, %34, %cst_25 [1] : vector<8x8xf32> to vector<8xf32>
    %36 = vector.shape_cast %35 : vector<8xf32> to vector<8x1xf32>
    %37 = arith.truncf %34 : vector<8x8xf32> to vector<8x8xbf16>
    %cst_26 = arith.constant dense<0.000000e+00> : vector<8x16xf32>
    %38 = tpu.matmul %37, %28, %cst_26 {dimension_numbers = #tpu.dot_dimension_numbers<[1], [0], [0], [1], [0, 0, 1, 1], [], []>} : vector<8x8xbf16>, vector<8x16xbf16>, vector<8x16xf32> -> vector<8x16xf32>
    %39 = tpu.reciprocal %36 {approx = true} : vector<8x1xf32> -> vector<8x1xf32>
    %40 = vector.broadcast %39 : vector<8x1xf32> to vector<8x16xf32>
    %41 = arith.mulf %38, %40 : vector<8x16xf32>
    %42 = arith.truncf %41 : vector<8x16xf32> to vector<8x16xbf16>
    %43 = vector.extract_strided_slice %13 {offsets = [0, 16], sizes = [8, 16], strides = [1, 1]} : vector<8x64xbf16> to vector<8x16xbf16>
    %44 = vector.extract_strided_slice %19 {offsets = [16, 0], sizes = [16, 8], strides = [1, 1]} : vector<64x8xbf16> to vector<16x8xbf16>
    %45 = vector.extract_strided_slice %25 {offsets = [0, 16], sizes = [8, 16], strides = [1, 1]} : vector<8x64xbf16> to vector<8x16xbf16>
    %cst_27 = arith.constant dense<0.000000e+00> : vector<8x8xf32>
    %46 = tpu.matmul %43, %44, %cst_27 {dimension_numbers = #tpu.dot_dimension_numbers<[1], [0], [0], [1], [0, 0, 1, 1], [], []>} : vector<8x16xbf16>, vector<16x8xbf16>, vector<8x8xf32> -> vector<8x8xf32>
    %cst_28 = arith.constant dense<0xFF800000> : vector<8xf32>
    %47 = vector.multi_reduction <maximumf>, %46, %cst_28 [1] : vector<8x8xf32> to vector<8xf32>
    %48 = vector.shape_cast %47 : vector<8xf32> to vector<8x1xf32>
    %49 = vector.broadcast %48 : vector<8x1xf32> to vector<8x8xf32>
    %50 = arith.subf %46, %49 : vector<8x8xf32>
    %51 = math.exp %50 : vector<8x8xf32>
    %cst_29 = arith.constant dense<0.000000e+00> : vector<8xf32>
    %52 = vector.multi_reduction <add>, %51, %cst_29 [1] : vector<8x8xf32> to vector<8xf32>
    %53 = vector.shape_cast %52 : vector<8xf32> to vector<8x1xf32>
    %54 = arith.truncf %51 : vector<8x8xf32> to vector<8x8xbf16>
    %cst_30 = arith.constant dense<0.000000e+00> : vector<8x16xf32>
    %55 = tpu.matmul %54, %45, %cst_30 {dimension_numbers = #tpu.dot_dimension_numbers<[1], [0], [0], [1], [0, 0, 1, 1], [], []>} : vector<8x8xbf16>, vector<8x16xbf16>, vector<8x16xf32> -> vector<8x16xf32>
    %56 = tpu.reciprocal %53 {approx = true} : vector<8x1xf32> -> vector<8x1xf32>
    %57 = vector.broadcast %56 : vector<8x1xf32> to vector<8x16xf32>
    %58 = arith.mulf %55, %57 : vector<8x16xf32>
    %59 = arith.truncf %58 : vector<8x16xf32> to vector<8x16xbf16>
    %60 = vector.extract_strided_slice %13 {offsets = [0, 32], sizes = [8, 16], strides = [1, 1]} : vector<8x64xbf16> to vector<8x16xbf16>
    %61 = vector.extract_strided_slice %19 {offsets = [32, 0], sizes = [16, 8], strides = [1, 1]} : vector<64x8xbf16> to vector<16x8xbf16>
    %62 = vector.extract_strided_slice %25 {offsets = [0, 32], sizes = [8, 16], strides = [1, 1]} : vector<8x64xbf16> to vector<8x16xbf16>
    %cst_31 = arith.constant dense<0.000000e+00> : vector<8x8xf32>
    %63 = tpu.matmul %60, %61, %cst_31 {dimension_numbers = #tpu.dot_dimension_numbers<[1], [0], [0], [1], [0, 0, 1, 1], [], []>} : vector<8x16xbf16>, vector<16x8xbf16>, vector<8x8xf32> -> vector<8x8xf32>
    %cst_32 = arith.constant dense<0xFF800000> : vector<8xf32>
    %64 = vector.multi_reduction <maximumf>, %63, %cst_32 [1] : vector<8x8xf32> to vector<8xf32>
    %65 = vector.shape_cast %64 : vector<8xf32> to vector<8x1xf32>
    %66 = vector.broadcast %65 : vector<8x1xf32> to vector<8x8xf32>
    %67 = arith.subf %63, %66 : vector<8x8xf32>
    %68 = math.exp %67 : vector<8x8xf32>
    %cst_33 = arith.constant dense<0.000000e+00> : vector<8xf32>
    %69 = vector.multi_reduction <add>, %68, %cst_33 [1] : vector<8x8xf32> to vector<8xf32>
    %70 = vector.shape_cast %69 : vector<8xf32> to vector<8x1xf32>
    %71 = arith.truncf %68 : vector<8x8xf32> to vector<8x8xbf16>
    %cst_34 = arith.constant dense<0.000000e+00> : vector<8x16xf32>
    %72 = tpu.matmul %71, %62, %cst_34 {dimension_numbers = #tpu.dot_dimension_numbers<[1], [0], [0], [1], [0, 0, 1, 1], [], []>} : vector<8x8xbf16>, vector<8x16xbf16>, vector<8x16xf32> -> vector<8x16xf32>
    %73 = tpu.reciprocal %70 {approx = true} : vector<8x1xf32> -> vector<8x1xf32>
    %74 = vector.broadcast %73 : vector<8x1xf32> to vector<8x16xf32>
    %75 = arith.mulf %72, %74 : vector<8x16xf32>
    %76 = arith.truncf %75 : vector<8x16xf32> to vector<8x16xbf16>
    %77 = vector.extract_strided_slice %13 {offsets = [0, 48], sizes = [8, 16], strides = [1, 1]} : vector<8x64xbf16> to vector<8x16xbf16>
    %78 = vector.extract_strided_slice %19 {offsets = [48, 0], sizes = [16, 8], strides = [1, 1]} : vector<64x8xbf16> to vector<16x8xbf16>
    %79 = vector.extract_strided_slice %25 {offsets = [0, 48], sizes = [8, 16], strides = [1, 1]} : vector<8x64xbf16> to vector<8x16xbf16>
    %cst_35 = arith.constant dense<0.000000e+00> : vector<8x8xf32>
    %80 = tpu.matmul %77, %78, %cst_35 {dimension_numbers = #tpu.dot_dimension_numbers<[1], [0], [0], [1], [0, 0, 1, 1], [], []>} : vector<8x16xbf16>, vector<16x8xbf16>, vector<8x8xf32> -> vector<8x8xf32>
    %cst_36 = arith.constant dense<0xFF800000> : vector<8xf32>
    %81 = vector.multi_reduction <maximumf>, %80, %cst_36 [1] : vector<8x8xf32> to vector<8xf32>
    %82 = vector.shape_cast %81 : vector<8xf32> to vector<8x1xf32>
    %83 = vector.broadcast %82 : vector<8x1xf32> to vector<8x8xf32>
    %84 = arith.subf %80, %83 : vector<8x8xf32>
    %85 = math.exp %84 : vector<8x8xf32>
    %cst_37 = arith.constant dense<0.000000e+00> : vector<8xf32>
    %86 = vector.multi_reduction <add>, %85, %cst_37 [1] : vector<8x8xf32> to vector<8xf32>
    %87 = vector.shape_cast %86 : vector<8xf32> to vector<8x1xf32>
    %88 = arith.truncf %85 : vector<8x8xf32> to vector<8x8xbf16>
    %cst_38 = arith.constant dense<0.000000e+00> : vector<8x16xf32>
    %89 = tpu.matmul %88, %79, %cst_38 {dimension_numbers = #tpu.dot_dimension_numbers<[1], [0], [0], [1], [0, 0, 1, 1], [], []>} : vector<8x8xbf16>, vector<8x16xbf16>, vector<8x16xf32> -> vector<8x16xf32>
    %90 = tpu.reciprocal %87 {approx = true} : vector<8x1xf32> -> vector<8x1xf32>
    %91 = vector.broadcast %90 : vector<8x1xf32> to vector<8x16xf32>
    %92 = arith.mulf %89, %91 : vector<8x16xf32>
    %93 = arith.truncf %92 : vector<8x16xf32> to vector<8x16xbf16>
    %94 = tpu.concatenate %42, %59, %76, %93 in 1 : vector<8x16xbf16>, vector<8x16xbf16>, vector<8x16xbf16>, vector<8x16xbf16> -> vector<8x64xbf16>
    %c0_39 = arith.constant 0 : index
    %c0_40 = arith.constant 0 : index
    %95 = vector.load %arg11[%c0_39, %c0_40] : memref<64x32xbf16, #tpu.memory_space<vmem>>, vector<64x32xbf16>
    %cst_41 = arith.constant dense<0.000000e+00> : vector<8x32xf32>
    %96 = tpu.matmul %94, %95, %cst_41 {dimension_numbers = #tpu.dot_dimension_numbers<[1], [0], [0], [1], [0, 0, 1, 1], [], []>} : vector<8x64xbf16>, vector<64x32xbf16>, vector<8x32xf32> -> vector<8x32xf32>
    %c0_42 = arith.constant 0 : index
    %c0_43 = arith.constant 0 : index
    %97 = vector.load %arg12[%c0_42, %c0_43] : memref<1x32xf32, #tpu.memory_space<vmem>>, vector<1x32xf32>
    %98 = vector.broadcast %97 : vector<1x32xf32> to vector<8x32xf32>
    %99 = arith.addf %96, %98 : vector<8x32xf32>
    %c0_44 = arith.constant 0 : index
    %c0_45 = arith.constant 0 : index
    %c0_46 = arith.constant 0 : index
    %100 = vector.load %arg13[%c0_44, %c0_45, %c0_46] : memref<1x8x32xf32, #tpu.memory_space<vmem>>, vector<1x8x32xf32>
    %101 = vector.shape_cast %100 : vector<1x8x32xf32> to vector<8x32xf32>
    %102 = vector.shape_cast %99 : vector<8x32xf32> to vector<1x8x32xf32>
    tpu.vector_store %arg13[%c0_44, %c0_45, %c0_46], %102 {strides = array<i32>} : memref<1x8x32xf32, #tpu.memory_space<vmem>>, vector<1x8x32xf32>,
    return
  }
  func.func @transform_0(%arg0: i32, %arg1: i32) -> (i32, i32, i32) {
    %c0_i32 = arith.constant 0 : i32
    %c0_i32_0 = arith.constant 0 : i32
    return %arg0, %arg1, %c0_i32 : i32, i32, i32
  }
  func.func @transform_1(%arg0: i32, %arg1: i32) -> (i32, i32, i32) {
    %c0_i32 = arith.constant 0 : i32
    %c0_i32_0 = arith.constant 0 : i32
    %c0_i32_1 = arith.constant 0 : i32
    return %arg0, %c0_i32, %c0_i32_0 : i32, i32, i32
  }
  func.func @transform_2(%arg0: i32, %arg1: i32) -> (i32, i32, i32) {
    %c0_i32 = arith.constant 0 : i32
    %c0_i32_0 = arith.constant 0 : i32
    %c0_i32_1 = arith.constant 0 : i32
    return %arg0, %c0_i32, %c0_i32_0 : i32, i32, i32
  }
  func.func @transform_3(%arg0: i32, %arg1: i32) -> (i32, i32) {
    %c0_i32 = arith.constant 0 : i32
    %c0_i32_0 = arith.constant 0 : i32
    %c0_i32_1 = arith.constant 0 : i32
    return %c0_i32, %c0_i32_0 : i32, i32
  }
  func.func @transform_4(%arg0: i32, %arg1: i32) -> (i32, i32) {
    %c0_i32 = arith.constant 0 : i32
    %c0_i32_0 = arith.constant 0 : i32
    %c0_i32_1 = arith.constant 0 : i32
    return %c0_i32, %c0_i32_0 : i32, i32
  }
  func.func @transform_5(%arg0: i32, %arg1: i32) -> (i32, i32) {
    %c0_i32 = arith.constant 0 : i32
    %c0_i32_0 = arith.constant 0 : i32
    %c0_i32_1 = arith.constant 0 : i32
    return %c0_i32, %c0_i32_0 : i32, i32
  }
  func.func @transform_6(%arg0: i32, %arg1: i32) -> (i32, i32) {
    %c0_i32 = arith.constant 0 : i32
    %c0_i32_0 = arith.constant 0 : i32
    %c0_i32_1 = arith.constant 0 : i32
    return %c0_i32, %c0_i32_0 : i32, i32
  }
  func.func @transform_7(%arg0: i32, %arg1: i32) -> (i32, i32) {
    %c0_i32 = arith.constant 0 : i32
    %c0_i32_0 = arith.constant 0 : i32
    %c0_i32_1 = arith.constant 0 : i32
    return %c0_i32, %c0_i32_0 : i32, i32
  }
  func.func @transform_8(%arg0: i32, %arg1: i32) -> (i32, i32) {
    %c0_i32 = arith.constant 0 : i32
    %c0_i32_0 = arith.constant 0 : i32
    %c0_i32_1 = arith.constant 0 : i32
    return %c0_i32, %c0_i32_0 : i32, i32
  }
  func.func @transform_9(%arg0: i32, %arg1: i32) -> (i32, i32) {
    %c0_i32 = arith.constant 0 : i32
    %c0_i32_0 = arith.constant 0 : i32
    %c0_i32_1 = arith.constant 0 : i32
    return %c0_i32, %c0_i32_0 : i32, i32
  }
  func.func @transform_10(%arg0: i32, %arg1: i32) -> (i32, i32) {
    %c0_i32 = arith.constant 0 : i32
    %c0_i32_0 = arith.constant 0 : i32
    %c0_i32_1 = arith.constant 0 : i32
    return %c0_i32, %c0_i32_0 : i32, i32
  }
  func.func @transform_11(%arg0: i32, %arg1: i32) -> (i32, i32, i32) {
    %c0_i32 = arith.constant 0 : i32
    %c0_i32_0 = arith.constant 0 : i32
    return %arg0, %arg1, %c0_i32 : i32, i32, i32
  }
}

</mosaic_0001>

<bundles_post_ra>
// kernel: tpu_custom_call.1
= control target key start
LH: loop header
LB: loop body
LE: loop exit
PB: predicated region body
PF: predicated region fallthrough
CT: control target
= control target key end

     0   :  { %s2046_s0 = inlined_call_operand.vmem [shape: bf16[2,8,32], index: 0, kind: input, shape index: {}]   ;;  %s2047_s1 = inlined_call_operand.vmem [shape: bf16[2,8,32], index: 1, kind: input, shape index: {}]   ;;  %s2048_s2 = inlined_call_operand.vmem [shape: bf16[2,8,32], index: 2, kind: input, shape index: {}]   ;;  %s2049_s3 = inlined_call_operand.vmem [shape: bf16[32,64], index: 3, kind: input, shape index: {}]   ;;  %s2050_s4 = inlined_call_operand.vmem [shape: f32[1,64], index: 4, kind: input, shape index: {}]   ;;  %s2051_s5 = inlined_call_operand.vmem [shape: bf16[64,32], index: 5, kind: input, shape index: {}]   ;;  %s2052_s6 = inlined_call_operand.vmem [shape: f32[64,1], index: 6, kind: input, shape index: {}]   ;;  %s2053_s7 = inlined_call_operand.vmem [shape: bf16[32,64], index: 7, kind: input, shape index: {}]   ;;  %s2054_s8 = inlined_call_operand.vmem [shape: f32[1,64], index: 8, kind: input, shape index: {}]   ;;  %s2055_s9 = inlined_call_operand.vmem [shape: bf16[64,32], index: 9, kind: input, shape index: {}]   ;;  %s2056_s10 = inlined_call_operand.vmem [shape: f32[1,32], index: 10, kind: input, shape index: {}]   ;;  %s2057_s11 = inlined_call_operand.hbm [shape: f32[2,8,32], index: 11, kind: output, shape index: {}]  }
   0x1   :  { %2060 = sst [smem:[#allocation8_spill]] %s2049_s3 }
   0x2   :  { %16 = vsyncpa [#allocation3], 0 }
   0x3   :  { %18 = vsyncpa [#allocation3 + $0x1], 0  ;;  %s1780_s17 = smov 0   ;;  %s1782_s18 = smov 0  }
   0x4   :  { %s1784_s19 = smov 0   ;;  %s1786_s20 = smov 0  }
   0x5   :  { %s1788_s21 = smov 0   ;;  %s1790_s22 = smov 0  }
   0x6 LB: > { %2061 = sst [smem:[#allocation5_spill]] %s1704_s21  ;;  %s1376_s23 = sadd.s32 4294967295, %s1708_s22   ;;  %s1708_s22 = sphi %s1790_s22, %s24_s22   ;;  %s1704_s21 = sphi %s1788_s21, %s2069_s21   ;;  %s1700_s20 = sphi %s1786_s20, %s2068_s20   ;;  %s1696_s19 = sphi %s1784_s19, %s2072_s19   ;;  %s1692_s18 = sphi %s1782_s18, %s2071_s18   ;;  %s1688_s17 = sphi %s1780_s17, %s2070_s17  }
   0x7   : > { %s1377_s24 = sadd.s32 4294967294, %s1708_s22   ;;  %s36_s25 = sadd.s32 1, %s1704_s21 }
   0x8   : > { %s293_s26 = sadd.s32 1, %s1696_s19  ;;  %p38_p0 = scmp.ge.s32.totalorder %s36_s25, 2 }
   0x9   : > { %p303_p1 = scmp.ne.s32.totalorder %s1696_s19, %s1692_s18  ;;  %p304_p2 = scmp.eq.s32.totalorder %s1376_s23, 1 }
   0xa   : > { %p309_p3 = scmp.ne.s32.totalorder %s1692_s18, %s1688_s17  ;;  %s2074_s25 = smov (%p38_p0, %s36_s25), 0 }
   0xb   : > { %2062 = sst [smem:[#allocation6_spill]] %s2074_s25  ;;  %p1820_p4 = por %p304_p2, %p303_p1 }
   0xc   : > { %p310_p5 = scmp.eq.s32.totalorder %s1377_s24, 1  ;;  %s288_s28 = ssub.s32 %s1704_s21, %s2074_s25 }
   0xd   : > { %p1380_p6 = scmp.ge.s32.totalorder %s1708_s22, 1  ;;  %p291_p7 = scmp.eq.s32.totalorder %s288_s28, 0 }
   0xe   : > { %p1827_p8 = por %p310_p5, %p309_p3  ;;  %p376_p9 = scmp.lt.s32.totalorder %s1708_s22, 3 }
   0xf   : > { %s1833_s30 = scalar_select %p291_p7, %s1696_s19, %s293_s26  }
  0x10   : > { %p377_p10 = pnand %p1380_p6, %p376_p9 }
  0x11   : > { %2065 = sst [smem:[#allocation7_spill]] %s1833_s30  ;;  %p426_p11 = scmp.lt.s32.totalorder (!%p377_p10), %s1700_s20, 1 }
  0x12   : > { %380 = sbr.rel (%p377_p10) target bundleno = 1240 (0x4d8), region = 64  ;;  %s2066_s3 = sld [smem:[#allocation8_spill]] (!%p377_p10) }
  0x13   : > { %s1714_s26 = smov (!%p377_p10), 112   ;;  %s1715_s21 = smov (!%p377_p10), 80  }
  0x14   : > { %s1717_s25 = smov (!%p377_p10), 32   ;;  %s423_s30 = sand.u32 (!%p377_p10), 1, %s1692_s18  }
  0x15   : > { %s1381_s28 = sshll.u32 (!%p377_p10), %s423_s30, 3  ;;  %s1416_s14 = sshll.u32 (!%p377_p10), %s1700_s20, 7 }
  0x17   : > { %v1710_v1 = vmov 0.0   ;;  %vm1711_vm0 = vmmov 0   ;;  %s427_s16 = scalar_select %p426_p11, %s1700_s20, 1  ;;  %v1712_v3 = vmov 0   ;;  %vm468_vm1 = vcmask 261120   ;;  %v1606_v4 = vld [vmem:[%s2051_s5] sm:$0xff]  }
  0x18   : > { %v1604_v0 = vld [vmem:[%s2066_s3 + $0x8] sm:$0xff]   ;;  %1451 = vmatprep.subr.bf16.mxu1 %v1710_v1  ;;  %1469 = vmatprep.subr.bf16.mxu0 %v1710_v1  ;;  %v1605_v2 = vld [vmem:[%s2066_s3] sm:$0xff]   ;;  %v524_v6 = vld [vmem:[%s2052_s6 + $0x10] sm:$0xff]  ;;  %vm741_vm2 = vcmask 130048   ;;  %vm799_vm3 = vcmask 1043456   ;;  %vm785_vm4 = vcmask 64512  }
  0x19   : > { %1452 = vmatpush3.bf16.msra.mxu1 %v1604_v0  ;;  %1455 = vmatprep.mubr.msk.bf16.mxu1 %vm1711_vm0, %v1710_v1  ;;  %s1850_s23 = sshll.u32 %s427_s16, 2  ;;  %v522_v5 = vld [vmem:[%s2052_s6] sm:$0xff]  ;;  %v523_v9 = vld [vmem:[%s2052_s6 + $0x8] sm:$0xff]  ;;  %v525_v11 = vld [vmem:[%s2052_s6 + $0x18] sm:$0xff]  ;;  %vm1180_vm5 = vcmask 392192   ;;  %vm1222_vm6 = vcmask 523264  }
  0x1a   : > { %1453 = vmatprep.subr.bf16.mxu1 %v1710_v1  ;;  %1473 = vmatprep.mubr.msk.bf16.mxu0 %vm1711_vm0, %v1710_v1  ;;  %s432_s15 = scalar_lea.vmem %s2046_s0, %s1850_s23  ;;  %s436_s16 = scalar_lea.vmem %s2047_s1, %s1850_s23  ;;  %v526_v12 = vld [vmem:[%s2052_s6 + $0x20] sm:$0xff]  ;;  %v1607_v13 = vld [vmem:[%s2051_s5 + $0x8] sm:$0xff]   ;;  %v1608_v15 = vld [vmem:[%s2051_s5 + $0x10] sm:$0xff]  }
  0x1b   : > { %1602 = vset.pattern.permute.xlu0 %v1712_v3  ;;  %1603 = vset.pattern.permute.xlu1 %v1712_v3  ;;  %v442_v7 = vld [vmem:[%s432_s15] sm:$0xf]  ;;  %v527_v14 = vld [vmem:[%s2052_s6 + $0x28] sm:$0xff]  ;;  %v528_v16 = vld [vmem:[%s2052_s6 + $0x30] sm:$0xff]  ;;  %s440_s15 = scalar_lea.vmem %s2048_s2, %s1850_s23  ;;  %s1713_s23 = smov 96  }
  0x1c   : > { %532 = vperm.xlu0 %1602, %v522_v5   ;;  %v443_v8 = vld [vmem:[%s436_s16] sm:$0xf]  ;;  %542 = vperm.xlu1 %1603, %v524_v6   ;;  %v1609_v17 = vld [vmem:[%s2051_s5 + $0x18] sm:$0xff]   ;;  %v1610_v18 = vld [vmem:[%s2053_s7 + $0x8] sm:$0xff]   ;;  %s1267_s3 = scalar_lea.sflag [#allocation3], %s423_s30 }
  0x1d   : > { %1454 = vmatpush3.bf16.msra.mxu1 %v1605_v2  ;;  %v603_v10 = vsel %vm468_vm1, %v443_v8, 0  ;;  %1470 = vmatpush3.bf16.msra.mxu0 %v1610_v18  ;;  %v1611_v19 = vld [vmem:[%s2053_s7] sm:$0xff]   ;;  %v529_v31 = vld [vmem:[%s2052_s6 + $0x38] sm:$0xff] }
  0x1e   : > { %1537 = vmatprep.subr.msk.bf16.mxu1 %vm468_vm1, %v443_v8  ;;  %1471 = vmatprep.subr.bf16.mxu0 %v1710_v1  ;;  %v444_v20 = vld [vmem:[%s440_s15] sm:$0xf]  ;;  %s425_s15 = scalar_lea.vmem [#allocation2], %s1381_s28 }
  0x1f   : > { %v1385_v21 = vld [vmem:[%s2050_s4] ss:$0 sm:$0xff]  ;;  %s1281_s16 = sshll.u32 %s425_s15, 4  ;;  %s2001_s16 = int_to_ptr.vmem [resolvable:$true] %s1281_s16 }
  0x20   : > { %1456 = vmatmul.mubr.msk.bf16.vlgmr.msra.gmra.mxu1 %vm468_vm1, %v442_v7  ;;  %537 = vperm.xlu0 %1602, %v523_v9   ;;  %v1397_v48 = vld [vmem:[%s2054_s8] ss:$0 sm:$0xff]  ;;  %s1632_s20 = scalar_lea.vmem %s2001_s16, 128 }
  0x21   : > { %1460 = vmatpush3.bf16.xpose.msra.mxu1 %v603_v10  ;;  %1461 = vmatprep.mubr.msk.bf16.mxu1 %vm468_vm1, %v1606_v4  ;;  %p1633_p12 = scmp.ne.s32.totalorder %s2001_s16, %s1632_s20 }
  0x22   : > { %1483 = vmatprep.subr.bf16.mxu1 %v1710_v1  ;;  %547 = vperm.xlu1 %1603, %v525_v11  }
  0x23   : > { %1472 = vmatpush3.bf16.msra.mxu0 %v1611_v19  ;;  %p1634_p13 = pnand %p1633_p12, %p1820_p4 }
  0x24   : > { %552 = vperm.xlu0 %1602, %v526_v12   ;;  %1477 = vmatprep.subr.bf16.mxu0 %v1710_v1 }
  0x25   : > { %p1635_p0 = pneg %p1634_p13 }
  0x26   : > { %557 = vperm.xlu1 %1603, %v527_v14   ;;  %1474 = vmatmul.mubr.msk.bf16.vlgmr.msra.gmra.mxu0 %vm468_vm1, %v444_v20 }
  0x27   : > { %1479 = vmatprep.mubr.msk.bf16.mxu0 %vm1711_vm0, %v1710_v1 }
  0x28   : > { %1462 = vmatmul.mubr.msk.bf16.vlgmr.msra.gmra.mxu1 %vm468_vm1, %v1607_v13 }
  0x29   : > { %1465 = vmatprep.mubr.msk.bf16.mxu1 %vm468_vm1, %v1608_v15 }
  0x2a   : > { %562 = vperm.xlu1 %1603, %v528_v16  }
  0x30   : > { %1466 = vmatmul.mubr.msk.bf16.gmra.mxu1 %vm468_vm1, %v1609_v17 }
  0x31   : > { %1485 = vmatprep.mubr.msk.bf16.mxu1 %vm1711_vm0, %v1710_v1 }
  0x97   : > { %v533_v29 = vpop.permute.xlu0 %532  ;;  %v543_v32 = vpop.permute.xlu1 %542 }
  0x9b   : > { %v538_v35 = vpop.permute.xlu0 %537 }
  0x9d   : > { %v548_v38 = vpop.permute.xlu1 %547 }
  0x9f   : > { %v553_v55 = vpop.permute.xlu0 %552 }
  0xa1   : > { %v558_v56 = vpop.permute.xlu1 %557 }
  0xa5   : > { %v563_v62 = vpop.permute.xlu1 %562 }
  0xe0   : > { %v506_v22 = vpop.f32.mrf.mxu1 }
  0xe1   : > { %v507_v23 = vadd.f32 %v1385_v21, %v506_v22 }
  0xe2   : > { %v1457_v24 = vpop.f32.mrf.mxu1 }
  0xe3   : > { %v512_v25 = vmul.f32 0.25, %v507_v23 }
  0xe4   : > { %v509_v26 = vpop.f32.mrf.mxu1 }
  0xe5   : > { %v513_v27 = vpack.c.bf16 %v512_v25, %v512_v25 }
  0xe6   : > { %v1458_v28 = vpop.f32.mrf.mxu1  ;;  %v734_v44 = vpop.f32.mrf.mxu0 }
  0xe7   : > { %954 = vrot.lane.b32.xlu1 %v513_v27, %s1713_s23  ;;  %847 = vrot.lane.b32.xlu0 %v513_v27, %s1714_s26  ;;  %v735_v49 = vadd.f32 %v1397_v48, %v734_v44 }
  0xe8   : > { %v1463_v30 = vpop.f32.mrf.mxu1  ;;  %v1475_v45 = vpop.f32.mrf.mxu0 }
  0xe9   : > { %v648_v40 = vadd.f32 %v1463_v30, %v543_v32  ;;  %v740_v51 = vpack.c.bf16 %v735_v49, %v735_v49 }
  0xea   : > { %v639_v33 = vpop.f32.mrf.mxu1  ;;  %v737_v46 = vpop.f32.mrf.mxu0 }
  0xeb   : > { %567 = vperm.xlu0 %1602, %v529_v31   ;;  %v640_v36 = vadd.f32 %v639_v33, %v533_v29  ;;  %v801_v53 = vsel %vm799_vm3, %v740_v51, 0 }
  0xec   : > { %v1464_v34 = vpop.f32.mrf.mxu1  ;;  %v1476_v47 = vpop.f32.mrf.mxu0  ;;  %1484 = vmatpush3.bf16.msra.mxu1 %v801_v53 }
  0xed   : > { %v651_v41 = vadd.f32 %v1464_v34, %v548_v38  ;;  %1495 = vmatprep.subr.bf16.mxu1 %v1710_v1 }
  0xee   : > { %v642_v37 = vpop.f32.mrf.mxu1 }
  0xef   : > { %v643_v39 = vadd.f32 %v642_v37, %v538_v35  ;;  %1060 = vrot.lane.b32.xlu0 %v513_v27, %s1715_s21  ;;  %v671_v43 = vpack.c.bf16 %v651_v41, %v648_v40 }
  0xf0   : > { %v1467_v50 = vpop.f32.mrf.mxu1 }
  0xf1   : > { %v670_v42 = vpack.c.bf16 %v643_v39, %v640_v36  ;;  %v664_v2 = vadd.f32 %v1467_v50, %v563_v62  ;;  %v1612_v62 = vld [vmem:[%s2055_s9 + $0x18] sm:$0xff]  }
  0xf2   : > { %v655_v52 = vpop.f32.mrf.mxu1 }
  0xf3   : > { %1478 = vmatpush3.bf16.msra.mxu0 %v670_v42  ;;  %v656_v58 = vadd.f32 %v655_v52, %v553_v55 }
  0xf4   : > { %1489 = vmatprep.subr.bf16.mxu0 %v1710_v1  ;;  %v1468_v54 = vpop.f32.mrf.mxu1 }
  0xf6   : > { %1480 = vmatmul.mubr.msk.bf16.vlgmr.msra.gmra.mxu0 %vm741_vm2, %v513_v27  ;;  %v658_v57 = vpop.f32.mrf.mxu1 }
  0xf7   : > { %1490 = vmatpush3.bf16.msra.mxu0 %v671_v43  ;;  %1491 = vmatprep.mubr.msk.bf16.mxu0 %vm1711_vm0, %v1710_v1  ;;  %v659_v59 = vadd.f32 %v658_v57, %v558_v56 }
  0xf8   : > { %1501 = vmatprep.subr.bf16.mxu0 %v1710_v1 }
  0xf9   : > { %v672_v60 = vpack.c.bf16 %v659_v59, %v656_v58 }
 0x159   : > { %v848_v61 = vpop.permute.xlu0 %847  ;;  %v955_v63 = vpop.permute.xlu1 %954 }
 0x15a   : > { %1492 = vmatmul.mubr.msk.bf16.vlgmr.msra.gmra.mxu0 %vm741_vm2, %v848_v61 }
 0x15b   : > { %1502 = vmatpush3.bf16.msra.mxu0 %v672_v60  ;;  %1503 = vmatprep.mubr.msk.bf16.mxu0 %vm1711_vm0, %v1710_v1 }
 0x15c   : > { %1513 = vmatprep.subr.bf16.mxu0 %v1710_v1 }
 0x162   : > { %1504 = vmatmul.mubr.msk.bf16.vlgmr.msra.gmra.mxu0 %vm741_vm2, %v955_v63 }
 0x163   : > { %1515 = vmatprep.mubr.msk.bf16.mxu0 %vm1711_vm0, %v1710_v1 }
 0x166   : > { %v568_v0 = vpop.permute.xlu0 %567 }
 0x167   : > { %v667_v3 = vadd.f32 %v1468_v54, %v568_v0 }
 0x169   : > { %v673_v4 = vpack.c.bf16 %v667_v3, %v664_v2  ;;  %v1613_v2 = vld [vmem:[%s2055_s9 + $0x10] sm:$0xff]  }
 0x16a   : > { %v1061_v5 = vpop.permute.xlu0 %1060 }
 0x16b   : > { %1514 = vmatpush3.bf16.msra.mxu0 %v673_v4 }
 0x16c   : > { %1525 = vmatprep.subr.bf16.mxu0 %v1710_v1 }
 0x16e   : > { %1516 = vmatmul.mubr.msk.bf16.vlgmr.msra.gmra.mxu0 %vm741_vm2, %v1061_v5  ;;  %v1614_v5 = vld [vmem:[%s2055_s9 + $0x8] sm:$0xff]  }
 0x16f   : > { %1533 = vmatprep.mubr.msk.bf16.mxu0 %vm1711_vm0, %v1710_v1  ;;  %1526 = vmatpush3.bf16.msra.mxu0 %v1612_v62 }
 0x170   : > { %1527 = vmatprep.subr.bf16.mxu0 %v1710_v1 }
 0x173   : > { %1528 = vmatpush3.bf16.msra.mxu0 %v1613_v2 }
 0x174   : > { %1529 = vmatprep.subr.bf16.mxu0 %v1710_v1 }
 0x177   : > { %1530 = vmatpush3.bf16.msra.mxu0 %v1614_v5 }
 0x178   : > { %1531 = vmatprep.subr.bf16.mxu0 %v1710_v1 }
 0x1b6   : > { %v779_v6 = vpop.f32.mrf.mxu0 }
 0x1b7   : > { %v786_v7 = vsel %vm785_vm4, %v779_v6, -inf }
 0x1b8   : > { %787 = vmax.xlane.f32.xlu1 %v786_v7  ;;  %v1481_v8 = vpop.f32.mrf.mxu0 }
 0x1ba   : > { %v782_v9 = vpop.f32.mrf.mxu0 }
 0x1bc   : > { %v1482_v10 = vpop.f32.mrf.mxu0 }
 0x1bd   : > { %v1615_v10 = vld [vmem:[%s2055_s9] sm:$0xff]  }
 0x1be   : > { %1532 = vmatpush3.bf16.msra.mxu0 %v1615_v10 }
 0x1c9   : > { %1009 = vrot.lane.b32.xlu1 %v740_v51, %s1713_s23  ;;  %s1716_s23 = smov 16  }
 0x21a   : > { %v886_v11 = vpop.f32.mrf.mxu0 }
 0x21b   : > { %v892_v12 = vsel %vm785_vm4, %v886_v11, -inf }
 0x21c   : > { %893 = vmax.xlane.f32.xlu0 %v892_v12  ;;  %v1493_v13 = vpop.f32.mrf.mxu0 }
 0x21e   : > { %v889_v14 = vpop.f32.mrf.mxu0 }
 0x220   : > { %v1494_v15 = vpop.f32.mrf.mxu0 }
 0x222   : > { %v993_v16 = vpop.f32.mrf.mxu0 }
 0x223   : > { %v999_v17 = vsel %vm785_vm4, %v993_v16, -inf }
 0x224   : > { %1000 = vmax.xlane.f32.xlu0 %v999_v17  ;;  %v1505_v18 = vpop.f32.mrf.mxu0 }
 0x226   : > { %v996_v19 = vpop.f32.mrf.mxu0 }
 0x228   : > { %v1506_v20 = vpop.f32.mrf.mxu0 }
 0x22e   : > { %v1099_v21 = vpop.f32.mrf.mxu0 }
 0x22f   : > { %v1105_v22 = vsel %vm785_vm4, %v1099_v21, -inf }
 0x230   : > { %1106 = vmax.xlane.f32.xlu1 %v1105_v22  ;;  %v1517_v23 = vpop.f32.mrf.mxu0 }
 0x232   : > { %v1102_v24 = vpop.f32.mrf.mxu0 }
 0x234   : > { %v1518_v25 = vpop.f32.mrf.mxu0 }
 0x23a   : > { %903 = vrot.lane.b32.xlu0 %v740_v51, %s1714_s26  ;;  %s1999_s26 = scalar_lea.hbm %s2057_s11, %s1416_s14 }
 0x241   : > { %v788_v26 = vpop.xlane.xlu1 %787  ;;  %1115 = vrot.lane.b32.xlu1 %v740_v51, %s1715_s21  ;;  %s1718_s21 = smov 48  }
 0x242   : > { %v789_v27 = vsub.f32 %v779_v6, %v788_v26 }
 0x244   : > { %v790_v28 = vmul.f32 1.442695, %v789_v27 }
 0x245   : > { %v1010_v39 = vpop.permute.xlu1 %1009 }
 0x246   : > { %1616 = vpow2.f32 %v790_v28  ;;  %v1015_v44 = vsel %vm799_vm3, %v1010_v39, 0 }
 0x253   : > { %v1617_v29 = vpop.eup %1616 }
 0x254   : > { %v795_v30 = vpack.c.bf16 %v1617_v29, %v1617_v29  ;;  %v792_v55 = vsel %vm785_vm4, %v1617_v29, 0.0 }
 0x256   : > { %1486 = vmatmul.mubr.msk.bf16.vlgmr.msra.gmra.mxu1 %vm785_vm4, %v795_v30 }
 0x257   : > { %1497 = vmatprep.mubr.msk.bf16.mxu1 %vm1711_vm0, %v1710_v1 }
 0x2a5   : > { %v894_v31 = vpop.xlane.xlu0 %893 }
 0x2a6   : > { %v895_v32 = vsub.f32 %v886_v11, %v894_v31 }
 0x2a8   : > { %v896_v33 = vmul.f32 1.442695, %v895_v32 }
 0x2aa   : > { %1618 = vpow2.f32 %v896_v33 }
 0x2ad   : > { %v1001_v34 = vpop.xlane.xlu0 %1000 }
 0x2ae   : > { %v1002_v35 = vsub.f32 %v993_v16, %v1001_v34  ;;  %v1409_v34 = vld [vmem:[%s2056_s10] ss:$0 sm:$0xff] }
 0x2b0   : > { %v1003_v36 = vmul.f32 1.442695, %v1002_v35 }
 0x2b1   : > { %v904_v37 = vpop.permute.xlu0 %903 }
 0x2b2   : > { %1620 = vpow2.f32 %v1003_v36  ;;  %v909_v38 = vsel %vm799_vm3, %v904_v37, 0 }
 0x2b3   : > { %1496 = vmatpush3.bf16.msra.mxu1 %v909_v38 }
 0x2b4   : > { %1507 = vmatprep.subr.bf16.mxu1 %v1710_v1 }
 0x2b7   : > { %v1619_v40 = vpop.eup %1618 }
 0x2b8   : > { %v898_v41 = vsel %vm785_vm4, %v1619_v40, 0.0  ;;  %v901_v42 = vpack.c.bf16 %v1619_v40, %v1619_v40 }
 0x2b9   : > { %899 = vadd.xlane.f32.xlu0 %v898_v41  ;;  %v1107_v43 = vpop.xlane.xlu1 %1106 }
 0x2ba   : > { %v1108_v45 = vsub.f32 %v1099_v21, %v1107_v43  ;;  %1498 = vmatmul.mubr.msk.bf16.vlgmr.msra.gmra.mxu1 %vm785_vm4, %v901_v42 }
 0x2bb   : > { %1508 = vmatpush3.bf16.msra.mxu1 %v1015_v44  ;;  %1509 = vmatprep.mubr.msk.bf16.mxu1 %vm1711_vm0, %v1710_v1 }
 0x2bc   : > { %v1109_v46 = vmul.f32 1.442695, %v1108_v45  ;;  %1519 = vmatprep.subr.bf16.mxu1 %v1710_v1 }
 0x2bd   : > { %v1116_v48 = vpop.permute.xlu1 %1115 }
 0x2be   : > { %1622 = vpow2.f32 %v1109_v46  ;;  %v1121_v51 = vsel %vm799_vm3, %v1116_v48, 0 }
 0x2bf   : > { %v1621_v47 = vpop.eup %1620 }
 0x2c0   : > { %v1005_v49 = vsel %vm785_vm4, %v1621_v47, 0.0  ;;  %v1008_v50 = vpack.c.bf16 %v1621_v47, %v1621_v47 }
 0x2c1   : > { %1006 = vadd.xlane.f32.xlu1 %v1005_v49 }
 0x2c2   : > { %1510 = vmatmul.mubr.msk.bf16.vlgmr.msra.gmra.mxu1 %vm785_vm4, %v1008_v50 }
 0x2c3   : > { %1520 = vmatpush3.bf16.msra.mxu1 %v1121_v51  ;;  %1521 = vmatprep.mubr.msk.bf16.mxu1 %vm1711_vm0, %v1710_v1 }
 0x2cb   : > { %v1623_v52 = vpop.eup %1622 }
 0x2cc   : > { %v1111_v53 = vsel %vm785_vm4, %v1623_v52, 0.0  ;;  %v1114_v54 = vpack.c.bf16 %v1623_v52, %v1623_v52 }
 0x2cd   : > { %1112 = vadd.xlane.f32.xlu0 %v1111_v53 }
 0x2ce   : > { %1522 = vmatmul.mubr.msk.bf16.vlgmr.msra.gmra.mxu1 %vm785_vm4, %v1114_v54 }
 0x2d1   : > { %793 = vadd.xlane.f32.xlu0 %v792_v55 }
 0x316   : > { %v837_v56 = vpop.f32.mrf.mxu1 }
 0x318   : > { %v1487_v57 = vpop.f32.mrf.mxu1 }
 0x31a   : > { %v840_v58 = vpop.f32.mrf.mxu1 }
 0x31c   : > { %v1488_v59 = vpop.f32.mrf.mxu1 }
 0x342   : > { %v900_v60 = vpop.xlane.xlu0 %899 }
 0x343   : > { %1624 = vrcp.f32 %v900_v60 }
 0x34a   : > { %v1007_v61 = vpop.xlane.xlu1 %1006 }
 0x34b   : > { %1626 = vrcp.f32 %v1007_v61 }
 0x350   : > { %v1625_v63 = vpop.eup %1624 }
 0x356   : > { %v1113_v7 = vpop.xlane.xlu0 %1112 }
 0x357   : > { %1628 = vrcp.f32 %v1113_v7 }
 0x358   : > { %v1627_v11 = vpop.eup %1626 }
 0x35a   : > { %v794_v24 = vpop.xlane.xlu0 %793 }
 0x35b   : > { %1630 = vrcp.f32 %v794_v24 }
 0x364   : > { %v1629_v18 = vpop.eup %1628 }
 0x368   : > { %v1631_v25 = vpop.eup %1630 }
 0x369   : > { %v844_v26 = vmul.f32 %v1631_v25, %v837_v56 }
 0x36b   : > { %v845_v28 = vpack.c.bf16 %v844_v26, %v844_v26 }
 0x37a   : > { %v945_v0 = vpop.f32.mrf.mxu1 }
 0x37b   : > { %v952_v3 = vmul.f32 %v1625_v63, %v945_v0 }
 0x37c   : > { %v1499_v4 = vpop.f32.mrf.mxu1 }
 0x37d   : > { %v953_v6 = vpack.c.bf16 %v952_v3, %v952_v3 }
 0x37e   : > { %v948_v8 = vpop.f32.mrf.mxu1 }
 0x37f   : > { %1167 = vrot.lane.b32.xlu1 %v953_v6, %s1716_s23 }
 0x380   : > { %v1500_v9 = vpop.f32.mrf.mxu1 }
 0x382   : > { %v1051_v12 = vpop.f32.mrf.mxu1 }
 0x383   : > { %v1058_v13 = vmul.f32 %v1627_v11, %v1051_v12 }
 0x384   : > { %v1511_v14 = vpop.f32.mrf.mxu1 }
 0x385   : > { %v1059_v15 = vpack.c.bf16 %v1058_v13, %v1058_v13 }
 0x386   : > { %v1054_v16 = vpop.f32.mrf.mxu1 }
 0x387   : > { %1170 = vrot.lane.b32.xlu0 %v1059_v15, %s1717_s25  ;;  %s1719_s25 = smov [#allocation2]  }
 0x388   : > { %v1512_v17 = vpop.f32.mrf.mxu1 }
 0x38e   : > { %v1157_v19 = vpop.f32.mrf.mxu1 }
 0x38f   : > { %v1164_v20 = vmul.f32 %v1629_v18, %v1157_v19 }
 0x390   : > { %v1523_v21 = vpop.f32.mrf.mxu1 }
 0x391   : > { %v1165_v22 = vpack.c.bf16 %v1164_v20, %v1164_v20 }
 0x392   : > { %v1160_v23 = vpop.f32.mrf.mxu1 }
 0x393   : > { %1173 = vrot.lane.b32.xlu1 %v1165_v22, %s1718_s21  ;;  %s1636_s21 = sshll.u32 %s1719_s25, 4  ;;  %s1637_s21 = int_to_ptr.vmem [resolvable:$false] %s1636_s21 }
 0x394   : > { %v1524_v1 = vpop.f32.mrf.mxu1  ;;  %s1638_s28 = scalar_lea.vmem %s1637_s21, 256  ;;  %p1639_p1 = scmp.lt.s32.totalorder %s2001_s16, %s1637_s21 }
 0x395   : > { %p1640_p2 = scmp.lt.s32.totalorder %s1638_s28, %s1632_s20 }
 0x397   : > { %p1641_p3 = por %p1640_p2, %p1639_p1 }
 0x399   : > { %p1642_p5 = pnand %p1641_p3, %p1635_p0 }
 0x3f1   : > { %v1168_v27 = vpop.permute.xlu1 %1167 }
 0x3f2   : > { %v1177_v30 = vsel %vm741_vm2, %v845_v28, %v1168_v27 }
 0x3f9   : > { %v1171_v29 = vpop.permute.xlu0 %1170 }
 0x3fa   : > { %v1179_v31 = vsel %vm468_vm1, %v1177_v30, %v1171_v29 }
 0x405   : > { %v1174_v32 = vpop.permute.xlu1 %1173 }
 0x406   : > { %v1182_v33 = vsel %vm1180_vm5, %v1179_v31, %v1174_v32 }
 0x407   : > { %1534 = vmatmul.mubr.msk.bf16.vlgmr.msra.gmra.mxu0 %vm1222_vm6, %v1182_v33 }
 0x4c7   : > { %v1259_v35 = vpop.f32.mrf.mxu0 }
 0x4c8   : > { %v1260_v36 = vadd.f32 %v1409_v34, %v1259_v35 }
 0x4c9   : > { %v1535_v37 = vpop.f32.mrf.mxu0 }
 0x4ca   : > { %1265 = vst.msk [vmem:[%s425_s15] sm:$0xff] %vm468_vm1, %v1260_v36 }
 0x4cb   : > { %v1262_v38 = vpop.f32.mrf.mxu0 }
 0x4cc   : > { %1645 = shalt.err (!%p1642_p5)
}
 0x4cd   : > { %s1646_s12 = scalar_lea.hbm %s1999_s26, 128  ;;  %s1650_s14 = scalar_lea.hbm %s2057_s11, 256 }
 0x4ce   : > { %p1647_p6 = scmp.ne.s32.totalorder %s1999_s26, %s1646_s12  ;;  %p1651_p10 = scmp.lt.s32.totalorder %s1999_s26, %s2057_s11 }
 0x4cf   : > { %p1652_p11 = scmp.lt.s32.totalorder %s1650_s14, %s1646_s12 }
 0x4d0   : > { %p1648_p7 = pnand %p1647_p6, %p1820_p4 }
 0x4d1   : > { %p1653_p12 = por %p1652_p11, %p1651_p10 }
 0x4d2   : > { %p1649_p9 = pneg %p1648_p7 }
 0x4d4   : > { %p1654_p13 = pnand %p1653_p12, %p1649_p9 }
 0x4d6   : > { %1657 = shalt.err (!%p1654_p13)
}
 0x4d7   : > { %1538 = dma.vmem_to_hbm [thread:$0]  (%p1820_p4), %s2001_s16, 128, %s1999_s26, %s1267_s3   ;;  %v1536_v39 = vpop.f32.mrf.mxu0 }
 0x4d8 PF: > { %p1544_p0 = scmp.ge.s32.totalorder %s1708_s22, 2  ;;  %s1293_s23 = sand.u32 1, %s1688_s17  }
 0x4d9   : > { %s1294_s20 = scalar_lea.sflag [#allocation3], %s1293_s23 }
 0x4da   : > { %p1541_p1 = pnand %p1544_p0, %p1827_p8 }
 0x4dc   : > { %p1542_p2 = pneg %p1541_p1 }
 0x4de   : > { %1683 = dma.done.wait (%p1542_p2), %s1294_s20, 128  }
 0x4df   : > { %1685 = vsyncadd (%p1542_p2), %s1294_s20, 4294967168  ;;  %s24_s22 = sadd.s32 1, %s1708_s22   ;;  %s2067_s27 = sld [smem:[#allocation7_spill]] }
 0x4e0   : > { %p21_p3 = scmp.ge.s32.totalorder %s24_s22, 4   ;;  %s2068_s20 = sld [smem:[#allocation5_spill]] }
 0x4e1   : > { %s2069_s21 = sld [smem:[#allocation6_spill]]  ;;  %s2070_s17 = smov %s1692_s18 }
 0x4e2   : > { %s2071_s18 = smov %s1696_s19  ;;  %23 = sbr.rel (!%p21_p3) target bundleno = 6 (0x6), region = 105 }
 0x4e5   : > { %s2072_s19 = smov %s2067_s27 }
 0x4e7   :  { %1299 = vsyncpa [#allocation3], 1 }
 0x4e8   :  { %1301 = vsyncpa [#allocation3 + $0x1], 1 }

</bundles_post_ra>
